<compile_context>
chip_gen: v5e
topology: v5e:2x2
jax: 0.10.0
libtpu: 0.0.40
codegen_flags: <defaults>
</compile_context>

<pallas_src>
import functools

import jax
import jax.numpy as jnp
from jax.experimental import pallas as pl
from jax.experimental.pallas import tpu as pltpu

HIDDEN = 128     # l1 output features
LANES = 128      # TPU lane width; pad the action dim to this for lane-dense stores
NEG_BIG = -1e30  # finite "-inf" used to mask padded action columns


def _round_up(n, m):
    return ((n + m - 1) // m) * m


def policy_kernel(x_ref, w1_ref, b1_ref, w2_ref, b2_ref, o_ref, *, action_size):
    """Fused Linear(3,128) -> ReLU -> Linear(128, 128pad) -> masked softmax.

    x_ref:  [TB, 3]      streamed batch tile
    w1_ref: [3, 128]     VMEM-resident across all tiles
    b1_ref: [1, 128]
    w2_ref: [128, 128]   action dim zero-padded to 128 lanes
    b2_ref: [1, 128]
    o_ref:  [TB, 128]    lane-dense output (wrapper slices to [B, A])
    """
    x = x_ref[...]                                   # [TB, 3] f32

    # First layer: K=3 contraction as 3 VPU broadcast FMAs (avoids a nearly
    # empty MXU systolic pass and keeps the MXU slot free).
    h = (x[:, 0:1] * w1_ref[0:1, :]
         + x[:, 1:2] * w1_ref[1:2, :]
         + x[:, 2:3] * w1_ref[2:3, :]
         + b1_ref[...])
    h = jnp.maximum(h, 0.0)                          # ReLU, [TB, 128]

    # Second layer: lane-dense 128x128 MXU matmul (action dim padded to 128).
    logits = jnp.dot(h, w2_ref[...], preferred_element_type=jnp.float32)
    logits = logits + b2_ref[...]                    # [TB, 128]

    # Mask padded action columns so they contribute nothing to the softmax.
    lane = jax.lax.broadcasted_iota(jnp.int32, logits.shape, 1)
    logits = jnp.where(lane < action_size, logits, NEG_BIG)

    # Numerically stable softmax over the action dim (dim=1 of the 2-D input).
    m = jnp.max(logits, axis=-1, keepdims=True)
    e = jnp.exp(logits - m)
    denom = jnp.sum(e, axis=-1, keepdims=True)
    o_ref[...] = (e / denom).astype(o_ref.dtype)


def policy_net_forward(x, w1, b1, w2, b2, *, block_b=512):
    """x: [B, 3]; w1: [3,128]; b1: [1,128]; w2: [128,A]; b2: [1,A] -> [B, A]."""
    B, f_in = x.shape
    assert f_in == 3
    h_dim, A = w2.shape
    assert h_dim == HIDDEN and 1 <= A <= LANES

    # Pad the action dim to a full 128-lane vreg (lane-dense matmul + stores).
    w2p = jnp.pad(w2.astype(jnp.float32), ((0, 0), (0, LANES - A)))
    b2p = jnp.pad(b2.astype(jnp.float32), ((0, 0), (0, LANES - A)))

    # Batch tile: multiple of 8 sublanes, capped by the (padded) batch size.
    tb = min(block_b, _round_up(B, 8))
    b_pad = _round_up(B, tb)
    x_p = jnp.pad(x.astype(jnp.float32), ((0, b_pad - B), (0, 0)))

    kernel = functools.partial(policy_kernel, action_size=A)
    out = pl.pallas_call(
        kernel,
        out_shape=jax.ShapeDtypeStruct((b_pad, LANES), jnp.float32),
        grid=(b_pad // tb,),
        in_specs=[
            pl.BlockSpec((tb, 3), lambda i: (i, 0)),        # x: streamed per tile
            pl.BlockSpec((3, HIDDEN), lambda i: (0, 0)),    # weights: VMEM resident
            pl.BlockSpec((1, HIDDEN), lambda i: (0, 0)),
            pl.BlockSpec((HIDDEN, LANES), lambda i: (0, 0)),
            pl.BlockSpec((1, LANES), lambda i: (0, 0)),
        ],
        out_specs=pl.BlockSpec((tb, LANES), lambda i: (i, 0)),
        compiler_params=pltpu.CompilerParams(
            # Batch tiles are independent -> shard across TensorCores on v7x.
            dimension_semantics=("parallel",),
        ),
    )(x_p, w1, b1, w2p, b2p)

    return out[:B, :A]


def init_params(key, action_size=1):
    # Deterministic init mimicking PyTorch nn.Linear default:
    # U(-1/sqrt(fan_in), 1/sqrt(fan_in)) for both weight and bias.
    k1, k2, k3, k4 = jax.random.split(key, 4)
    bound1 = 1.0 / jnp.sqrt(3.0)
    bound2 = 1.0 / jnp.sqrt(128.0)
    w1 = jax.random.uniform(k1, (3, HIDDEN), jnp.float32, -bound1, bound1)
    b1 = jax.random.uniform(k2, (1, HIDDEN), jnp.float32, -bound1, bound1)
    w2 = jax.random.uniform(k3, (HIDDEN, action_size), jnp.float32, -bound2, bound2)
    b2 = jax.random.uniform(k4, (1, action_size), jnp.float32, -bound2, bound2)
    return w1, b1, w2, b2


def _reference(x, w1, b1, w2, b2):
    h = jnp.maximum(x @ w1 + b1, 0.0)
    return jax.nn.softmax(h @ w2 + b2, axis=1)


if __name__ == "__main__":
    key = jax.random.PRNGKey(0)
    k_x, k_p, k_x2, k_p2 = jax.random.split(key, 4)

    # Case 1: module defaults (action_size=1), tiny batch as in the spec.
    batch, action_size = 2, 1
    x = jax.random.normal(k_x, (batch, 3), jnp.float32)   # pendulum obs: [cos, sin, vel]
    w1, b1, w2, b2 = init_params(k_p, action_size)
    out = jax.block_until_ready(policy_net_forward(x, w1, b1, w2, b2))
    ref = _reference(x, w1, b1, w2, b2)
    assert out.shape == (batch, action_size)
    assert jnp.allclose(out, ref, atol=1e-5, rtol=1e-5)

    # Case 2: multi-tile grid path (B not a multiple of the tile) with A > 1,
    # exercising padding, batch tiling and the masked softmax.
    batch2, action_size2 = 300, 4
    x2 = jax.random.normal(k_x2, (batch2, 3), jnp.float32)
    w1b, b1b, w2b, b2b = init_params(k_p2, action_size2)
    out2 = jax.block_until_ready(
        policy_net_forward(x2, w1b, b1b, w2b, b2b, block_b=128))
    ref2 = _reference(x2, w1b, b1b, w2b, b2b)
    assert out2.shape == (batch2, action_size2)
    assert jnp.allclose(out2, ref2, atol=1e-5, rtol=1e-5)
    assert jnp.allclose(jnp.sum(out2, axis=1), 1.0, atol=1e-5)

    print("KERNEL_OK")
</pallas_src>

<mosaic_0001>
module attributes {stable_mosaic.version = 11 : i64} {
  func.func @policy_kernel(%arg0: i32, %arg1: memref<8x3xf32, #tpu.memory_space<vmem>>, %arg2: memref<3x128xf32, #tpu.memory_space<vmem>>, %arg3: memref<1x128xf32, #tpu.memory_space<vmem>>, %arg4: memref<128x128xf32, #tpu.memory_space<vmem>>, %arg5: memref<1x128xf32, #tpu.memory_space<vmem>>, %arg6: memref<8x128xf32, #tpu.memory_space<vmem>>) attributes {dimension_semantics = [#tpu.dimension_semantics<parallel>], iteration_bounds = array<i64: 1>, scalar_prefetch = 0 : i64, scratch_operands = 0 : i64, tpu.core_type = #tpu.core_type<tc>, window_params = [{transform_indices = @transform_0, window_bounds = array<i64: 8, 3>}, {pipeline_mode = #tpu.pipeline_mode<synchronous>, transform_indices = @transform_1, window_bounds = array<i64: 3, 128>}, {pipeline_mode = #tpu.pipeline_mode<synchronous>, transform_indices = @transform_2, window_bounds = array<i64: 1, 128>}, {pipeline_mode = #tpu.pipeline_mode<synchronous>, transform_indices = @transform_3, window_bounds = array<i64: 128, 128>}, {pipeline_mode = #tpu.pipeline_mode<synchronous>, transform_indices = @transform_4, window_bounds = array<i64: 1, 128>}, {transform_indices = @transform_5, window_bounds = array<i64: 8, 128>}]} {
    %c0 = arith.constant 0 : index
    %c0_0 = arith.constant 0 : index
    %0 = vector.load %arg1[%c0, %c0_0] : memref<8x3xf32, #tpu.memory_space<vmem>>, vector<8x3xf32>
    %1 = vector.extract_strided_slice %0 {offsets = [0, 0], sizes = [8, 1], strides = [1, 1]} : vector<8x3xf32> to vector<8x1xf32>
    %c0_1 = arith.constant 0 : index
    %c0_2 = arith.constant 0 : index
    %2 = vector.load %arg2[%c0_1, %c0_2] : memref<3x128xf32, #tpu.memory_space<vmem>>, vector<1x128xf32>
    %3 = vector.broadcast %1 : vector<8x1xf32> to vector<8x128xf32>
    %4 = vector.broadcast %2 : vector<1x128xf32> to vector<8x128xf32>
    %5 = arith.mulf %3, %4 : vector<8x128xf32>
    %6 = vector.extract_strided_slice %0 {offsets = [0, 1], sizes = [8, 1], strides = [1, 1]} : vector<8x3xf32> to vector<8x1xf32>
    %c1 = arith.constant 1 : index
    %c0_3 = arith.constant 0 : index
    %7 = vector.load %arg2[%c1, %c0_3] : memref<3x128xf32, #tpu.memory_space<vmem>>, vector<1x128xf32>
    %8 = vector.broadcast %6 : vector<8x1xf32> to vector<8x128xf32>
    %9 = vector.broadcast %7 : vector<1x128xf32> to vector<8x128xf32>
    %10 = arith.mulf %8, %9 : vector<8x128xf32>
    %11 = arith.addf %5, %10 : vector<8x128xf32>
    %12 = vector.extract_strided_slice %0 {offsets = [0, 2], sizes = [8, 1], strides = [1, 1]} : vector<8x3xf32> to vector<8x1xf32>
    %c2 = arith.constant 2 : index
    %c0_4 = arith.constant 0 : index
    %13 = vector.load %arg2[%c2, %c0_4] : memref<3x128xf32, #tpu.memory_space<vmem>>, vector<1x128xf32>
    %14 = vector.broadcast %12 : vector<8x1xf32> to vector<8x128xf32>
    %15 = vector.broadcast %13 : vector<1x128xf32> to vector<8x128xf32>
    %16 = arith.mulf %14, %15 : vector<8x128xf32>
    %17 = arith.addf %11, %16 : vector<8x128xf32>
    %c0_5 = arith.constant 0 : index
    %c0_6 = arith.constant 0 : index
    %18 = vector.load %arg3[%c0_5, %c0_6] : memref<1x128xf32, #tpu.memory_space<vmem>>, vector<1x128xf32>
    %19 = vector.broadcast %18 : vector<1x128xf32> to vector<8x128xf32>
    %20 = arith.addf %17, %19 : vector<8x128xf32>
    %cst = arith.constant 0.000000e+00 : f32
    %21 = vector.broadcast %cst : f32 to vector<8x128xf32>
    %22 = arith.maximumf %20, %21 : vector<8x128xf32>
    %c0_7 = arith.constant 0 : index
    %c0_8 = arith.constant 0 : index
    %23 = vector.load %arg4[%c0_7, %c0_8] : memref<128x128xf32, #tpu.memory_space<vmem>>, vector<128x128xf32>
    %cst_9 = arith.constant dense<0.000000e+00> : vector<8x128xf32>
    %24 = tpu.matmul %22, %23, %cst_9 {dimension_numbers = #tpu.dot_dimension_numbers<[1], [0], [0], [1], [0, 0, 1, 1], [], []>} : vector<8x128xf32>, vector<128x128xf32>, vector<8x128xf32> -> vector<8x128xf32>
    %c0_10 = arith.constant 0 : index
    %c0_11 = arith.constant 0 : index
    %25 = vector.load %arg5[%c0_10, %c0_11] : memref<1x128xf32, #tpu.memory_space<vmem>>, vector<1x128xf32>
    %26 = vector.broadcast %25 : vector<1x128xf32> to vector<8x128xf32>
    %27 = arith.addf %24, %26 : vector<8x128xf32>
    %28 = tpu.iota {dimensions = array<i32: 1>} : vector<8x128xi32>
    %c1_i32 = arith.constant 1 : i32
    %29 = vector.broadcast %c1_i32 : i32 to vector<8x128xi32>
    %30 = arith.cmpi slt, %28, %29 : vector<8x128xi32>
    %cst_12 = arith.constant -1.000000e+30 : f32
    %31 = vector.broadcast %cst_12 : f32 to vector<8x128xf32>
    %32 = arith.select %30, %27, %31 : vector<8x128xi1>, vector<8x128xf32>
    %cst_13 = arith.constant dense<0xFF800000> : vector<8xf32>
    %33 = vector.multi_reduction <maximumf>, %32, %cst_13 [1] : vector<8x128xf32> to vector<8xf32>
    %34 = vector.shape_cast %33 : vector<8xf32> to vector<8x1xf32>
    %35 = vector.broadcast %34 : vector<8x1xf32> to vector<8x128xf32>
    %36 = arith.subf %32, %35 : vector<8x128xf32>
    %37 = math.exp %36 : vector<8x128xf32>
    %cst_14 = arith.constant dense<0.000000e+00> : vector<8xf32>
    %38 = vector.multi_reduction <add>, %37, %cst_14 [1] : vector<8x128xf32> to vector<8xf32>
    %39 = vector.shape_cast %38 : vector<8xf32> to vector<8x1xf32>
    %40 = vector.broadcast %39 : vector<8x1xf32> to vector<8x128xf32>
    %41 = arith.divf %37, %40 : vector<8x128xf32>
    %c0_15 = arith.constant 0 : index
    %c0_16 = arith.constant 0 : index
    %42 = vector.load %arg6[%c0_15, %c0_16] : memref<8x128xf32, #tpu.memory_space<vmem>>, vector<8x128xf32>
    tpu.vector_store %arg6[%c0_15, %c0_16], %41 {strides = array<i32>} : memref<8x128xf32, #tpu.memory_space<vmem>>, vector<8x128xf32>,
    return
  }
  func.func @transform_0(%arg0: i32) -> (i32, i32) {
    %c0_i32 = arith.constant 0 : i32
    %c0_i32_0 = arith.constant 0 : i32
    return %arg0, %c0_i32 : i32, i32
  }
  func.func @transform_1(%arg0: i32) -> (i32, i32) {
    %c0_i32 = arith.constant 0 : i32
    %c0_i32_0 = arith.constant 0 : i32
    %c0_i32_1 = arith.constant 0 : i32
    return %c0_i32, %c0_i32_0 : i32, i32
  }
  func.func @transform_2(%arg0: i32) -> (i32, i32) {
    %c0_i32 = arith.constant 0 : i32
    %c0_i32_0 = arith.constant 0 : i32
    %c0_i32_1 = arith.constant 0 : i32
    return %c0_i32, %c0_i32_0 : i32, i32
  }
  func.func @transform_3(%arg0: i32) -> (i32, i32) {
    %c0_i32 = arith.constant 0 : i32
    %c0_i32_0 = arith.constant 0 : i32
    %c0_i32_1 = arith.constant 0 : i32
    return %c0_i32, %c0_i32_0 : i32, i32
  }
  func.func @transform_4(%arg0: i32) -> (i32, i32) {
    %c0_i32 = arith.constant 0 : i32
    %c0_i32_0 = arith.constant 0 : i32
    %c0_i32_1 = arith.constant 0 : i32
    return %c0_i32, %c0_i32_0 : i32, i32
  }
  func.func @transform_5(%arg0: i32) -> (i32, i32) {
    %c0_i32 = arith.constant 0 : i32
    %c0_i32_0 = arith.constant 0 : i32
    return %arg0, %c0_i32 : i32, i32
  }
}

</mosaic_0001>

<bundles_post_ra>
// kernel: tpu_custom_call.1
= control target key start
LH: loop header
LB: loop body
LE: loop exit
PB: predicated region body
PF: predicated region fallthrough
CT: control target
= control target key end

     0   :  { %10 = vsyncpa [#allocation3], 0  ;;  %s285_s0 = inlined_call_operand.vmem [shape: f32[8,3], index: 0, kind: input, shape index: {}]   ;;  %s286_s1 = inlined_call_operand.vmem [shape: f32[3,128], index: 1, kind: input, shape index: {}]   ;;  %s287_s2 = inlined_call_operand.vmem [shape: f32[1,128], index: 2, kind: input, shape index: {}]   ;;  %s288_s3 = inlined_call_operand.hbm [shape: f32[128,128], index: 3, kind: input, shape index: {}]   ;;  %s289_s4 = inlined_call_operand.vmem [shape: f32[1,128], index: 4, kind: input, shape index: {}]   ;;  %s290_s5 = inlined_call_operand.hbm [shape: f32[8,128], index: 5, kind: output, shape index: {}]  }
   0x1   :  { %11 = vsyncpa [#allocation4], 0  ;;  %s22_s20 = sshll.u32 %s288_s3, 4  ;;  %s224_s21 = smov [#allocation2]   ;;  %s23_s20 = int_to_ptr.hbm [resolvable:$true] %s22_s20 }
   0x2   :  { %s24_s22 = sshll.u32 %s224_s21, 4  ;;  %s225_s23 = smov 128   ;;  %s25_s22 = int_to_ptr.vmem [resolvable:$true] %s24_s22 }
   0x3   :  { %s226_s24 = smov 8  }
   0x4   :  { %30 = dma.hbm_to_vmem [thread:$0]  %s23_s20, 2048, %s25_s22, [#allocation3], %s225_s23, %s225_s23, %s226_s24  }
   0x5   :  { %220 = dma.done.wait [#allocation3], 2048  }
   0x6   :  { %221 = vsyncadd [#allocation3], 4294965248  ;;  %v227_v0 = vmov 0   ;;  %v228_v1 = vmov 2   ;;  %v37_v2 = vld [vmem:[%s285_s0] sm:$0xff]  ;;  %v83_v3 = vld [vmem:[#allocation2 + $0x78] sm:$0xff]  ;;  %v108_v34 = vlaneseq }
   0x7   :  { %159 = vset.pattern.permute.xlu0 %v227_v0  ;;  %161 = vset.pattern.permute.xlu1 %v228_v1  ;;  %v82_v4 = vld [vmem:[#allocation2 + $0x70] sm:$0xff]  ;;  %v81_v5 = vld [vmem:[#allocation2 + $0x68] sm:$0xff]  ;;  %v80_v6 = vld [vmem:[#allocation2 + $0x60] sm:$0xff]  ;;  %v229_v8 = vmov 1   ;;  %s142_s11 = sshll.u32 %s290_s5, 4  ;;  %s143_s11 = int_to_ptr.hbm [resolvable:$true] %s142_s11 }
   0x8   :  { %41 = vperm.xlu0 %159, %v37_v2   ;;  %56 = vperm.xlu1 %161, %v37_v2   ;;  %v79_v7 = vld [vmem:[#allocation2 + $0x58] sm:$0xff]  ;;  %v78_v9 = vld [vmem:[#allocation2 + $0x50] sm:$0xff]  ;;  %v77_v10 = vld [vmem:[#allocation2 + $0x48] sm:$0xff]  ;;  %v109_v35 = vand.u32 127, %v108_v34 }
   0x9   :  { %88 = vmatpush.msra.mxu0 %v83_v3  ;;  %v76_v11 = vld [vmem:[#allocation2 + $0x40] sm:$0xff]  ;;  %v75_v12 = vld [vmem:[#allocation2 + $0x38] sm:$0xff]  ;;  %v74_v13 = vld [vmem:[#allocation2 + $0x30] sm:$0xff] }
   0xa   :  { %v73_v14 = vld [vmem:[#allocation2 + $0x28] sm:$0xff]  ;;  %v72_v15 = vld [vmem:[#allocation2 + $0x20] sm:$0xff]  ;;  %v71_v16 = vld [vmem:[#allocation2 + $0x18] sm:$0xff]  ;;  %vm110_vm0 = vcmp.lt.s32.totalorder %v109_v35, 1 }
   0xb   :  { %89 = vmatpush.msra.mxu0 %v82_v4  ;;  %v70_v17 = vld [vmem:[#allocation2 + $0x10] sm:$0xff]  ;;  %v69_v18 = vld [vmem:[#allocation2 + $0x8] sm:$0xff]  ;;  %v68_v19 = vld [vmem:[#allocation2] sm:$0xff] }
   0xc   :  { %v163_v21 = vld [vmem:[%s286_s1] ss:$0 sm:$0xff]  ;;  %v164_v22 = vld [vmem:[%s286_s1 + $0x1] ss:$0 sm:$0xff]  ;;  %v165_v23 = vld [vmem:[%s286_s1 + $0x2] ss:$0 sm:$0xff] }
   0xd   :  { %90 = vmatpush.msra.mxu0 %v81_v5  ;;  %v166_v30 = vld [vmem:[%s287_s2] ss:$0 sm:$0xff]  ;;  %s230_s1 = smov [#allocation5]  }
   0xe   :  { %v167_v36 = vld [vmem:[%s289_s4] ss:$0 sm:$0xff]  ;;  %s140_s2 = sshll.u32 %s230_s1, 4  ;;  %s141_s2 = int_to_ptr.vmem [resolvable:$true] %s140_s2 }
   0xf   :  { %91 = vmatpush.msra.mxu0 %v80_v6 }
  0x10   :  { %160 = vset.pattern.permute.xlu0 %v229_v8 }
  0x11   :  { %48 = vperm.xlu0 %160, %v37_v2   ;;  %92 = vmatpush.msra.mxu0 %v79_v7 }
  0x13   :  { %93 = vmatpush.msra.mxu0 %v78_v9 }
  0x15   :  { %94 = vmatpush.msra.mxu0 %v77_v10 }
  0x17   :  { %95 = vmatpush.msra.mxu0 %v76_v11 }
  0x19   :  { %162 = vset.pattern.permute.xlu0 %v228_v1  ;;  %96 = vmatpush.msra.mxu0 %v75_v12 }
  0x1b   :  { %97 = vmatpush.msra.mxu0 %v74_v13 }
  0x1d   :  { %98 = vmatpush.msra.mxu0 %v73_v14 }
  0x1f   :  { %99 = vmatpush.msra.mxu0 %v72_v15 }
  0x21   :  { %100 = vmatpush.msra.mxu0 %v71_v16 }
  0x23   :  { %101 = vmatpush.msra.mxu0 %v70_v17 }
  0x25   :  { %102 = vmatpush.msra.mxu0 %v69_v18 }
  0x27   :  { %103 = vmatpush.msra.mxu0 %v68_v19 }
  0x7a   :  { %v42_v20 = vpop.permute.xlu0 %41  ;;  %v57_v24 = vpop.permute.xlu1 %56 }
  0x7b   :  { %v45_v26 = vmul.f32 %v163_v21, %v42_v20  ;;  %v60_v28 = vmul.f32 %v165_v23, %v57_v24 }
  0x83   :  { %v49_v25 = vpop.permute.xlu0 %48 }
  0x84   :  { %v52_v27 = vmul.f32 %v164_v22, %v49_v25 }
  0x86   :  { %v53_v29 = vadd.f32 %v52_v27, %v45_v26 }
  0x88   :  { %v61_v31 = vadd.f32 %v60_v28, %v53_v29 }
  0x8a   :  { %v66_v32 = vadd.f32 %v166_v30, %v61_v31 }
  0x8c   :  { %v67_v33 = vmax.f32 %v66_v32, 0.0 }
  0x8e   :  { %104 = vmatmul.f32.vlgmr.msra.gmra.mxu0 %v67_v33 }
 0x10b   :  { %v105_v37 = vpop.f32.mrf.mxu0 }
 0x10c   :  { %v106_v38 = vadd.f32 %v167_v36, %v105_v37 }
 0x10e   :  { %v111_v39 = vsel %vm110_vm0, %v106_v38, -1e+30 }
 0x10f   :  { %112 = vmax.xlane.f32.xlu1 %v111_v39 }
 0x182   :  { %v113_v40 = vpop.xlane.xlu1 %112 }
 0x183   :  { %v114_v41 = vsub.f32 %v111_v39, %v113_v40 }
 0x185   :  { %v115_v42 = vmul.f32 1.442695, %v114_v41 }
 0x187   :  { %168 = vpow2.f32 %v115_v42 }
 0x18d   :  { %v169_v43 = vpop.eup %168 }
 0x18e   :  { %117 = vadd.xlane.f32.xlu2 %v169_v43 }
 0x201   :  { %v118_v44 = vpop.xlane.xlu2 %117 }
 0x202   :  { %170 = vrcp.f32 %v118_v44  ;;  %v130_v48 = vand.u32 2147483648, %v118_v44  ;;  %v128_v50 = vand.u32 2147483647, %v118_v44  ;;  %vm124_vm2 = vweird.f32 %v118_v44 }
 0x204   :  { %v131_v52 = vor.u32 1.1754944e-38, %v130_v48  ;;  %vm129_vm4 = vcmp.eq.f32.partialorder %v128_v50, 8.507059e+37 }
 0x208   :  { %v171_v45 = vpop.eup %170 }
 0x209   :  { %v120_v46 = vmul.f32 %v171_v45, %v118_v44  ;;  %vm125_vm1 = vweird.f32 %v171_v45 }
 0x20a   :  { %vm126_vm3 = vmor %vm124_vm2, %vm125_vm1 }
 0x20b   :  { %v121_v47 = vsub.f32 1.0, %v120_v46 }
 0x20d   :  { %v122_v49 = vmul.f32 %v171_v45, %v121_v47 }
 0x20f   :  { %v123_v51 = vadd.f32 %v171_v45, %v122_v49 }
 0x211   :  { %v127_v53 = vsel %vm126_vm3, %v171_v45, %v123_v51 }
 0x212   :  { %v132_v54 = vsel %vm129_vm4, %v131_v52, %v127_v53 }
 0x213   :  { %v133_v55 = vmul.f32 %v169_v43, %v132_v54 }
 0x215   :  { %134 = vst [vmem:[#allocation5] sm:$0xff] %v133_v55 }
 0x216   :  { %145 = dma.vmem_to_hbm [thread:$0]  %s141_s2, 128, %s143_s11, [#allocation4]  }
 0x217   :  { %222 = dma.done.wait [#allocation4], 128  }
 0x218   :  { %223 = vsyncadd [#allocation4], 4294967168 }
 0x219   :  { %150 = vsyncpa [#allocation3], 1 }
 0x21a   :  { %151 = vsyncpa [#allocation4], 1 }

</bundles_post_ra>
